<compile_context>
chip_gen: v6e
topology: v6e:2x2x1
jax: 0.10.0
libtpu: 0.0.40
codegen_flags: <defaults>
</compile_context>

<pallas_src>
import functools
import math

import jax
import jax.numpy as jnp
from jax.experimental import pallas as pl
from jax.experimental.pallas import tpu as pltpu


_SUPPORTED_NONLINEARITIES = (None, "tanh", "sigmoid", "relu")

_LANE = 128      # lane width (last dim of every tile)
_SUBLANE = 16    # sublane granularity (covers bf16 packing; f32 only needs 8)


def _round_up(n, m):
    return ((n + m - 1) // m) * m


def _pick_tile(padded_dim, unit, cap):
    """Largest multiple of `unit` that divides `padded_dim` and is <= cap."""
    best = unit
    cap = max(unit, min(cap, padded_dim))
    for t in range(unit, cap + 1, unit):
        if padded_dim % t == 0:
            best = t
    return best


def _fc_kernel(x_ref, w_ref, b_ref, o_ref, acc_ref, *, nonlinearity):
    k = pl.program_id(2)

    @pl.when(k == 0)
    def _():
        acc_ref[...] = jnp.zeros_like(acc_ref)

    # MXU matmul. Both operands already share the streaming dtype (bf16 by
    # default, cast once in the wrapper); accumulation is f32.
    acc_ref[...] += jnp.dot(x_ref[...], w_ref[...],
                            preferred_element_type=jnp.float32)

    @pl.when(k == pl.num_programs(2) - 1)
    def _():
        # Epilogue on the f32 accumulator: bias + nonlinearity (EUP), one store.
        acc = acc_ref[...] + b_ref[...]            # (1, tn) f32 bias broadcasts
        if nonlinearity == "tanh":
            acc = jnp.tanh(acc)
        elif nonlinearity == "sigmoid":
            acc = jax.nn.sigmoid(acc)
        elif nonlinearity == "relu":
            acc = jnp.maximum(acc, 0.0)
        o_ref[...] = acc.astype(o_ref.dtype)


def fc_layer(x, w_t_padded, b2d_padded, out_features, nonlinearity=None, *,
             tm_cap=256, tn_cap=512, tk_cap=1024):
    """x: (B, In); w_t_padded: (Kp, Np) pre-padded/cast; b2d_padded: (1, Np) f32."""
    if nonlinearity not in _SUPPORTED_NONLINEARITIES:
        raise ValueError(f"unsupported nonlinearity: {nonlinearity}")

    B, In = x.shape
    Kp, Np = w_t_padded.shape
    assert Kp % _LANE == 0 and Np % _LANE == 0, (Kp, Np)
    assert In <= Kp and out_features <= Np, (In, Kp, out_features, Np)

    out_dtype = x.dtype
    compute_dtype = w_t_padded.dtype

    # Pad M only to the sublane granularity (not to the tile size).
    Mp = _round_up(max(B, _SUBLANE), _SUBLANE)

    # Tiles = largest aligned divisors of the padded dims, capped for VMEM.
    tm = _pick_tile(Mp, _SUBLANE, tm_cap)
    tn = _pick_tile(Np, _LANE, tn_cap)
    tk = _pick_tile(Kp, _LANE, tk_cap)

    # v7x megacore: ensure at least one *parallel* axis has >= 2 blocks when
    # alignment allows, so the grid shards across both TensorCores.
    if (Mp // tm) == 1 and (Np // tn) == 1:
        if tn >= 256 and tn % 256 == 0:
            tn //= 2
        elif tm >= 32 and tm % 32 == 0:
            tm //= 2

    # Pad x (batch-dependent, cheap) with zeros -- zero K columns add nothing
    # to the accumulator; padded M rows are sliced off below -- and cast ONCE
    # to the streaming dtype so the MXU runs bf16 x bf16 by default and no
    # per-tile cast happens inside the kernel.
    if (Mp, Kp) != (B, In):
        x = jnp.pad(x, ((0, Mp - B), (0, Kp - In)))
    if x.dtype != compute_dtype:
        x = x.astype(compute_dtype)

    grid = (Mp // tm, Np // tn, Kp // tk)
    kernel = functools.partial(_fc_kernel, nonlinearity=nonlinearity)

    isz = lambda d: jnp.dtype(d).itemsize
    # Cost estimate with padded sizes and re-streaming factors.
    bytes_accessed = (
        Mp * Kp * isz(compute_dtype) * (Np // tn)      # x re-read per N block
        + Kp * Np * isz(compute_dtype) * (Mp // tm)    # w re-read per M block
        + Np * 4                                       # bias
        + Mp * Np * isz(out_dtype)                     # output store
    )
    cost = pl.CostEstimate(
        flops=2 * Mp * Kp * Np,
        transcendentals=(Mp * Np) if nonlinearity in ("tanh", "sigmoid") else 0,
        bytes_accessed=bytes_accessed,
    )

    # Double-buffered VMEM working set; give explicit headroom but stay well
    # under v7x's 64 MiB physical / 32 MiB scoped VMEM (also fine on v5e/v6e).
    working_set = (
        2 * tm * tk * isz(compute_dtype)     # x tiles (double buffered)
        + 2 * tk * tn * isz(compute_dtype)   # w tiles
        + 2 * tn * 4                         # bias tiles
        + 2 * tm * tn * isz(out_dtype)       # out tiles
        + tm * tn * 4                        # f32 accumulator scratch
    )
    vmem_limit = int(min(32 * 2**20, max(8 * 2**20, 2 * working_set)))

    out = pl.pallas_call(
        kernel,
        out_shape=jax.ShapeDtypeStruct((Mp, Np), out_dtype),
        grid_spec=pltpu.PrefetchScalarGridSpec(
            num_scalar_prefetch=0,
            grid=grid,
            in_specs=[
                pl.BlockSpec((tm, tk), lambda i, j, k: (i, k)),   # x tile
                pl.BlockSpec((tk, tn), lambda i, j, k: (k, j)),   # w tile
                pl.BlockSpec((1, tn), lambda i, j, k: (0, j)),    # bias tile
            ],
            out_specs=pl.BlockSpec((tm, tn), lambda i, j, k: (i, j)),
            scratch_shapes=[pltpu.VMEM((tm, tn), jnp.float32)],   # f32 accumulator
        ),
        compiler_params=pltpu.CompilerParams(
            # M/N parallel -> megacore sharding; K (reduction) last, arbitrary.
            dimension_semantics=("parallel", "parallel", "arbitrary"),
            vmem_limit_bytes=vmem_limit,
        ),
        cost_estimate=cost,
    )(x, w_t_padded, b2d_padded)

    if (Mp, Np) != (B, out_features):
        out = out[:B, :out_features]
    return out


class FCLayerPallas:
    """Mirror of PyTorch FCLayer: Linear(input_size, hidden_size) + optional nonlinearity.

    Weights are transposed, zero-padded to lane-aligned shapes and cast to the
    streaming dtype (bf16 by default) ONCE here, so the forward pass does no
    per-call weight padding/casting.
    """

    def __init__(self, input_size, hidden_size, nonlinearity=None, key=None,
                 param_dtype=jnp.bfloat16, weight=None, bias=None):
        if nonlinearity not in _SUPPORTED_NONLINEARITIES:
            raise ValueError(f"unsupported nonlinearity: {nonlinearity}")
        self.input_size = input_size
        self.hidden_size = hidden_size
        self.nonlinearity = nonlinearity

        Kp = _round_up(input_size, _LANE)
        Np = _round_up(hidden_size, _LANE)

        if weight is None:
            if key is None:
                key = jax.random.PRNGKey(0)
            # init_hidden(): bias = 0, weight ~ U(-1/sqrt(in), 1/sqrt(in)),
            # PyTorch layout (hidden, input).
            initrange = 1.0 / math.sqrt(float(input_size))
            weight = jax.random.uniform(
                key, (hidden_size, input_size), jnp.float32,
                minval=-initrange, maxval=initrange)
        if bias is None:
            bias = jnp.zeros((hidden_size,), jnp.float32)

        w_t = jnp.asarray(weight, jnp.float32).T                     # (In, H)
        w_t = jnp.pad(w_t, ((0, Kp - input_size), (0, Np - hidden_size)))
        self.w_t = w_t.astype(param_dtype)                           # (Kp, Np)

        b2d = jnp.asarray(bias, jnp.float32).reshape(1, hidden_size)
        self.b2d = jnp.pad(b2d, ((0, 0), (0, Np - hidden_size)))     # (1, Np) f32

    def __call__(self, x):
        return fc_layer(x, self.w_t, self.b2d, self.hidden_size, self.nonlinearity)


if __name__ == "__main__":
    key = jax.random.PRNGKey(0)
    kx1, kw1, kb1, kx2, kw2, kb2 = jax.random.split(key, 6)

    # --- 1) Small layer, f32 params, tanh: tight-tolerance correctness ---
    batch, in1, h1 = 8, 32, 64
    x1 = jax.random.normal(kx1, (batch, in1), jnp.float32)
    layer1 = FCLayerPallas(in1, h1, nonlinearity="tanh", key=kw1,
                           param_dtype=jnp.float32,
                           bias=0.1 * jax.random.normal(kb1, (h1,), jnp.float32))
    out1 = jax.block_until_ready(layer1(x1))
    w1 = layer1.w_t[:in1, :h1]
    b1 = layer1.b2d[0, :h1]
    ref1 = jnp.tanh(x1 @ w1 + b1)
    assert out1.shape == (batch, h1)
    assert jnp.allclose(out1, ref1, atol=1e-5, rtol=1e-5), \
        float(jnp.max(jnp.abs(out1 - ref1)))

    # --- 2) Multi-K-block grid, default bf16 streaming, relu, ragged batch ---
    b2, in2, h2 = 200, 2048, 384
    x2 = jax.random.normal(kx2, (b2, in2), jnp.float32)
    layer2 = FCLayerPallas(in2, h2, nonlinearity="relu", key=kw2,
                           bias=0.1 * jax.random.normal(kb2, (h2,), jnp.float32))
    out2 = jax.block_until_ready(layer2(x2))
    w2 = layer2.w_t[:in2, :h2]                      # bf16
    b2d = layer2.b2d[0, :h2]
    ref2 = jnp.maximum(
        jnp.dot(x2.astype(jnp.bfloat16), w2,
                preferred_element_type=jnp.float32) + b2d,
        0.0,
    )
    assert out2.shape == (b2, h2)
    assert jnp.allclose(out2, ref2, atol=2e-2, rtol=2e-2), \
        float(jnp.max(jnp.abs(out2 - ref2)))

    print("KERNEL_OK")
</pallas_src>

<mosaic_0001>
module attributes {stable_mosaic.version = 11 : i64} {
  func.func @_fc_kernel(%arg0: i32, %arg1: i32, %arg2: i32, %arg3: memref<16x128xf32, #tpu.memory_space<vmem>>, %arg4: memref<128x128xf32, #tpu.memory_space<vmem>>, %arg5: memref<1x128xf32, #tpu.memory_space<vmem>>, %arg6: memref<16x128xf32, #tpu.memory_space<vmem>>, %arg7: memref<16x128xf32, #tpu.memory_space<vmem>>) attributes {dimension_semantics = [#tpu.dimension_semantics<parallel>, #tpu.dimension_semantics<parallel>, #tpu.dimension_semantics<arbitrary>], iteration_bounds = array<i64: 1, 1, 1>, scalar_prefetch = 0 : i64, scratch_operands = 1 : i64, tpu.core_type = #tpu.core_type<tc>, window_params = [{transform_indices = @transform_0, window_bounds = array<i64: 16, 128>}, {transform_indices = @transform_1, window_bounds = array<i64: 128, 128>}, {transform_indices = @transform_2, window_bounds = array<i64: 1, 128>}, {transform_indices = @transform_3, window_bounds = array<i64: 16, 128>}]} {
    %c0_i32 = arith.constant 0 : i32
    %0 = arith.cmpi eq, %arg2, %c0_i32 : i32
    %1 = arith.extui %0 : i1 to i32
    %c0_i32_0 = arith.constant 0 : i32
    %2 = arith.cmpi ne, %1, %c0_i32_0 : i32
    scf.if %2 {
      %cst_10 = arith.constant 0.000000e+00 : f32
      %12 = vector.broadcast %cst_10 : f32 to vector<16x128xf32>
      %c0_11 = arith.constant 0 : index
      %c0_12 = arith.constant 0 : index
      %13 = vector.load %arg7[%c0_11, %c0_12] : memref<16x128xf32, #tpu.memory_space<vmem>>, vector<16x128xf32>
      tpu.vector_store %arg7[%c0_11, %c0_12], %12 {strides = array<i32>} : memref<16x128xf32, #tpu.memory_space<vmem>>, vector<16x128xf32>,
    } else {
    }
    %c0 = arith.constant 0 : index
    %c0_1 = arith.constant 0 : index
    %3 = vector.load %arg7[%c0, %c0_1] : memref<16x128xf32, #tpu.memory_space<vmem>>, vector<16x128xf32>
    %c0_2 = arith.constant 0 : index
    %c0_3 = arith.constant 0 : index
    %4 = vector.load %arg3[%c0_2, %c0_3] : memref<16x128xf32, #tpu.memory_space<vmem>>, vector<16x128xf32>
    %c0_4 = arith.constant 0 : index
    %c0_5 = arith.constant 0 : index
    %5 = vector.load %arg4[%c0_4, %c0_5] : memref<128x128xf32, #tpu.memory_space<vmem>>, vector<128x128xf32>
    %cst = arith.constant dense<0.000000e+00> : vector<16x128xf32>
    %6 = tpu.matmul %4, %5, %cst {dimension_numbers = #tpu.dot_dimension_numbers<[1], [0], [0], [1], [0, 0, 1, 1], [], []>} : vector<16x128xf32>, vector<128x128xf32>, vector<16x128xf32> -> vector<16x128xf32>
    %7 = arith.addf %3, %6 : vector<16x128xf32>
    %c0_6 = arith.constant 0 : index
    %c0_7 = arith.constant 0 : index
    %8 = vector.load %arg7[%c0_6, %c0_7] : memref<16x128xf32, #tpu.memory_space<vmem>>, vector<16x128xf32>
    tpu.vector_store %arg7[%c0_6, %c0_7], %7 {strides = array<i32>} : memref<16x128xf32, #tpu.memory_space<vmem>>, vector<16x128xf32>,
    %c0_i32_8 = arith.constant 0 : i32
    %9 = arith.cmpi eq, %arg2, %c0_i32_8 : i32
    %10 = arith.extui %9 : i1 to i32
    %c0_i32_9 = arith.constant 0 : i32
    %11 = arith.cmpi ne, %10, %c0_i32_9 : i32
    scf.if %11 {
      %c0_10 = arith.constant 0 : index
      %c0_11 = arith.constant 0 : index
      %12 = vector.load %arg7[%c0_10, %c0_11] : memref<16x128xf32, #tpu.memory_space<vmem>>, vector<16x128xf32>
      %c0_12 = arith.constant 0 : index
      %c0_13 = arith.constant 0 : index
      %13 = vector.load %arg5[%c0_12, %c0_13] : memref<1x128xf32, #tpu.memory_space<vmem>>, vector<1x128xf32>
      %14 = vector.broadcast %13 : vector<1x128xf32> to vector<16x128xf32>
      %15 = arith.addf %12, %14 : vector<16x128xf32>
      %16 = math.tanh %15 : vector<16x128xf32>
      %c0_14 = arith.constant 0 : index
      %c0_15 = arith.constant 0 : index
      %17 = vector.load %arg6[%c0_14, %c0_15] : memref<16x128xf32, #tpu.memory_space<vmem>>, vector<16x128xf32>
      tpu.vector_store %arg6[%c0_14, %c0_15], %16 {strides = array<i32>} : memref<16x128xf32, #tpu.memory_space<vmem>>, vector<16x128xf32>,
    } else {
    }
    return
  }
  func.func @transform_0(%arg0: i32, %arg1: i32, %arg2: i32) -> (i32, i32) {
    %c0_i32 = arith.constant 0 : i32
    return %arg0, %arg2 : i32, i32
  }
  func.func @transform_1(%arg0: i32, %arg1: i32, %arg2: i32) -> (i32, i32) {
    %c0_i32 = arith.constant 0 : i32
    return %arg2, %arg1 : i32, i32
  }
  func.func @transform_2(%arg0: i32, %arg1: i32, %arg2: i32) -> (i32, i32) {
    %c0_i32 = arith.constant 0 : i32
    %c0_i32_0 = arith.constant 0 : i32
    return %c0_i32, %arg1 : i32, i32
  }
  func.func @transform_3(%arg0: i32, %arg1: i32, %arg2: i32) -> (i32, i32) {
    %c0_i32 = arith.constant 0 : i32
    return %arg0, %arg1 : i32, i32
  }
}

</mosaic_0001>

<bundles_post_ra>
// kernel: tpu_custom_call.1
= control target key start
LH: loop header
LB: loop body
LE: loop exit
PB: predicated region body
PF: predicated region fallthrough
CT: control target
= control target key end

     0   :  { %8 = vsyncpa [#allocation4], 0  ;;  %s359_s0 = inlined_call_operand.hbm [shape: f32[16,128], index: 0, kind: input, shape index: {}]   ;;  %s360_s1 = inlined_call_operand.hbm [shape: f32[128,128], index: 1, kind: input, shape index: {}]   ;;  %s361_s2 = inlined_call_operand.vmem [shape: f32[1,128], index: 2, kind: input, shape index: {}]   ;;  %s362_s3 = inlined_call_operand.hbm [shape: f32[16,128], index: 3, kind: output, shape index: {}]  }
   0x1   :  { %9 = vsyncpa [#allocation7], 0 }
   0x2   :  { %10 = vsyncpa [#allocation5], 0  ;;  %s313_s12 = smov [#allocation3]  }
   0x3   :  { %s16_s13 = sshll.u32 %s313_s12, 4  ;;  %s17_s13 = int_to_ptr.vmem [resolvable:$true] %s16_s13 }
   0x4   :  { %s255_s14 = scalar_lea.vmem %s17_s13, 256  ;;  %p260_p1 = scmp.lt.s32.totalorder %s17_s13, %s17_s13 }
   0x5   :  { %p256_p0 = scmp.ne.s32.totalorder %s17_s13, %s255_s14  ;;  %p261_p2 = scmp.lt.s32.totalorder %s255_s14, %s255_s14 }
   0x7   :  { %p262_p3 = por %p261_p2, %p260_p1 }
   0x9   :  { %p263_p4 = pnand %p262_p3, %p256_p0 }
   0xb   :  { %266 = shalt.err (!%p263_p4)
}
   0xc   :  { %s314_s15 = smov 128   ;;  %s315_s16 = smov 8  }
   0xd   :  { %22 = dma.hbm_to_vmem [thread:$0]  %s359_s0, 256, %s17_s13, [#allocation4], %s314_s15, %s314_s15, %s315_s16  }
   0xe   :  { %s316_s19 = smov [#allocation6]  }
   0xf   :  { %s28_s20 = sshll.u32 %s316_s19, 4  ;;  %s29_s20 = int_to_ptr.vmem [resolvable:$true] %s28_s20 }
  0x10   :  { %s275_s21 = scalar_lea.vmem %s29_s20, 2048  ;;  %p280_p6 = scmp.lt.s32.totalorder %s29_s20, %s29_s20 }
  0x11   :  { %p276_p5 = scmp.ne.s32.totalorder %s29_s20, %s275_s21  ;;  %p281_p7 = scmp.lt.s32.totalorder %s275_s21, %s275_s21 }
  0x13   :  { %p282_p8 = por %p281_p7, %p280_p6 }
  0x15   :  { %p283_p9 = pnand %p282_p8, %p276_p5 }
  0x17   :  { %286 = shalt.err (!%p283_p9)
}
  0x18   :  { %34 = dma.hbm_to_vmem [thread:$0]  %s360_s1, 2048, %s29_s20, [#allocation7], %s314_s15, %s314_s15, %s315_s16  }
  0x19   :  { %307 = dma.done.wait [#allocation4], 256  }
  0x1a   :  { %308 = vsyncadd [#allocation4], 4294967040 }
  0x1b   :  { %309 = dma.done.wait [#allocation7], 2048  }
  0x1c   :  { %310 = vsyncadd [#allocation7], 4294965248  ;;  %v68_v0 = vld [vmem:[#allocation6 + $0x78] sm:$0xff]  ;;  %v67_v1 = vld [vmem:[#allocation6 + $0x70] sm:$0xff]  ;;  %s317_s24 = smov [#allocation8]  }
  0x1d   :  { %203 = vmatprep.subr.mxu0 %v68_v0  ;;  %v66_v2 = vld [vmem:[#allocation6 + $0x68] sm:$0xff]  ;;  %v65_v3 = vld [vmem:[#allocation6 + $0x60] sm:$0xff]  ;;  %v51_v4 = vld [vmem:[#allocation3] sm:$0xff]  ;;  %s171_s25 = sshll.u32 %s317_s24, 4  ;;  %s172_s25 = int_to_ptr.vmem [resolvable:$true] %s171_s25 }
  0x1e   :  { %204 = vmatpush3.msra.mxu0 %v68_v0  ;;  %v64_v5 = vld [vmem:[#allocation6 + $0x58] sm:$0xff]  ;;  %235 = vmatprep.mubr.f32.mxu0 %v51_v4  ;;  %v63_v6 = vld [vmem:[#allocation6 + $0x50] sm:$0xff]  ;;  %v62_v7 = vld [vmem:[#allocation6 + $0x48] sm:$0xff]  ;;  %s287_s26 = scalar_lea.vmem %s172_s25, 256  ;;  %p292_p11 = scmp.lt.s32.totalorder %s172_s25, %s172_s25 }
  0x1f   :  { %205 = vmatprep.subr.mxu0 %v67_v1  ;;  %v61_v8 = vld [vmem:[#allocation6 + $0x40] sm:$0xff]  ;;  %v60_v9 = vld [vmem:[#allocation6 + $0x38] sm:$0xff]  ;;  %v59_v10 = vld [vmem:[#allocation6 + $0x30] sm:$0xff]  ;;  %p288_p10 = scmp.ne.s32.totalorder %s172_s25, %s287_s26  ;;  %p293_p12 = scmp.lt.s32.totalorder %s287_s26, %s287_s26 }
  0x20   :  { %206 = vmatpush3.msra.mxu0 %v67_v1  ;;  %v58_v11 = vld [vmem:[#allocation6 + $0x28] sm:$0xff]  ;;  %v57_v12 = vld [vmem:[#allocation6 + $0x20] sm:$0xff]  ;;  %v56_v13 = vld [vmem:[#allocation6 + $0x18] sm:$0xff] }
  0x21   :  { %207 = vmatprep.subr.mxu0 %v66_v2  ;;  %v55_v14 = vld [vmem:[#allocation6 + $0x10] sm:$0xff]  ;;  %v54_v15 = vld [vmem:[#allocation6 + $0x8] sm:$0xff]  ;;  %v53_v16 = vld [vmem:[#allocation6] sm:$0xff]  ;;  %p294_p13 = por %p293_p12, %p292_p11 }
  0x22   :  { %208 = vmatpush3.msra.mxu0 %v66_v2  ;;  %v52_v17 = vld [vmem:[#allocation3 + $0x8] sm:$0xff]  ;;  %v184_v18 = vld [vmem:[%s361_s2] ss:$0 sm:$0xff] }
  0x23   :  { %209 = vmatprep.subr.mxu0 %v65_v3  ;;  %p295_p0 = pnand %p294_p13, %p288_p10 }
  0x24   :  { %210 = vmatpush3.msra.mxu0 %v65_v3 }
  0x25   :  { %211 = vmatprep.subr.mxu0 %v64_v5 }
  0x26   :  { %212 = vmatpush3.msra.mxu0 %v64_v5 }
  0x27   :  { %213 = vmatprep.subr.mxu0 %v63_v6 }
  0x28   :  { %214 = vmatpush3.msra.mxu0 %v63_v6 }
  0x29   :  { %215 = vmatprep.subr.mxu0 %v62_v7 }
  0x2a   :  { %216 = vmatpush3.msra.mxu0 %v62_v7 }
  0x2b   :  { %217 = vmatprep.subr.mxu0 %v61_v8 }
  0x2c   :  { %218 = vmatpush3.msra.mxu0 %v61_v8 }
  0x2d   :  { %219 = vmatprep.subr.mxu0 %v60_v9 }
  0x2e   :  { %220 = vmatpush3.msra.mxu0 %v60_v9 }
  0x2f   :  { %221 = vmatprep.subr.mxu0 %v59_v10 }
  0x30   :  { %222 = vmatpush3.msra.mxu0 %v59_v10 }
  0x31   :  { %223 = vmatprep.subr.mxu0 %v58_v11 }
  0x32   :  { %224 = vmatpush3.msra.mxu0 %v58_v11 }
  0x33   :  { %225 = vmatprep.subr.mxu0 %v57_v12 }
  0x34   :  { %226 = vmatpush3.msra.mxu0 %v57_v12 }
  0x35   :  { %227 = vmatprep.subr.mxu0 %v56_v13 }
  0x36   :  { %228 = vmatpush3.msra.mxu0 %v56_v13 }
  0x37   :  { %229 = vmatprep.subr.mxu0 %v55_v14 }
  0x38   :  { %230 = vmatpush3.msra.mxu0 %v55_v14 }
  0x39   :  { %231 = vmatprep.subr.mxu0 %v54_v15 }
  0x3a   :  { %232 = vmatpush3.msra.mxu0 %v54_v15 }
  0x3b   :  { %233 = vmatprep.subr.mxu0 %v53_v16 }
  0x3c   :  { %234 = vmatpush3.msra.mxu0 %v53_v16 }
  0x3d   :  { %236 = vmatmul.mubr.f32.vlgmr.msra.gmra.mxu0 %v52_v17 }
  0xfd   :  { %v237_v19 = vpop.f32.mrf.mxu0 }
  0xfe   :  { %v161_v20 = vadd.f32 %v237_v19, %v184_v18 }
  0xff   :  { %v135_v21 = vpop.f32.mrf.mxu0 }
 0x100   :  { %243 = vtanh.f32 %v161_v20  ;;  %v160_v22 = vadd.f32 %v184_v18, %v135_v21 }
 0x102   :  { %245 = vtanh.f32 %v160_v22 }
 0x10d   :  { %v244_v23 = vpop.eup %243 }
 0x10e   :  { %165 = vst [vmem:[#allocation8 + $0x8] sm:$0xff] %v244_v23 }
 0x10f   :  { %v246_v24 = vpop.eup %245 }
 0x110   :  { %164 = vst [vmem:[#allocation8] sm:$0xff] %v246_v24 }
 0x111   :  { %298 = shalt.err (!%p295_p0)
}
 0x112   :  { %177 = dma.vmem_to_hbm [thread:$0]  %s172_s25, 256, %s362_s3, [#allocation5], %s314_s15, %s314_s15, %s315_s16  }
 0x113   :  { %311 = dma.done.wait [#allocation5], 256  }
 0x114   :  { %312 = vsyncadd [#allocation5], 4294967040 }
 0x115   :  { %181 = vsyncpa [#allocation4], 1 }
 0x116   :  { %182 = vsyncpa [#allocation7], 1 }
 0x117   :  { %183 = vsyncpa [#allocation5], 1 }

</bundles_post_ra>
